<compile_context>
chip_gen: v7x
topology: tpu7x:2x2x1
jax: 0.10.0
libtpu: 0.0.40
codegen_flags: <defaults>
</compile_context>

<pallas_src>
import jax
import jax.numpy as jnp
from jax.experimental import pallas as pl
from jax.experimental.pallas import tpu as pltpu


def qnet_kernel(x_ref, w1_ref, b1_ref, w2_ref, b2_ref, w3_ref, b3_ref, o_ref):
    # x is streamed f32; cast to the weight dtype (bf16 on the fast path) right before the
    # MXU pass.  K=8 / 32 / 64 matmuls are fine — the compiler lane-pads operands in VMEM.
    x = x_ref[...].astype(w1_ref.dtype)
    h1 = jnp.dot(x, w1_ref[...], preferred_element_type=jnp.float32)
    h1 = jnp.maximum(h1 + b1_ref[...], 0.0)                     # bias add + ReLU in f32
    h2 = jnp.dot(h1.astype(w2_ref.dtype), w2_ref[...], preferred_element_type=jnp.float32)
    h2 = jnp.maximum(h2 + b2_ref[...], 0.0)
    out = jnp.dot(h2.astype(w3_ref.dtype), w3_ref[...], preferred_element_type=jnp.float32)
    o_ref[...] = (out + b3_ref[...]).astype(o_ref.dtype)        # narrow (tb, action) store


def _round_up(n, m):
    return pl.cdiv(n, m) * m


def prepare_params(params, *, use_bf16=True):
    """One-time weight prep (hoisted out of the per-call path): cast weights to the MXU
    operand dtype, keep biases f32.  Call once and reuse across qnetwork_forward calls."""
    wdt = jnp.bfloat16 if use_bf16 else jnp.float32
    return {
        "w1": params["w1"].astype(wdt), "b1": params["b1"].astype(jnp.float32),
        "w2": params["w2"].astype(wdt), "b2": params["b2"].astype(jnp.float32),
        "w3": params["w3"].astype(wdt), "b3": params["b3"].astype(jnp.float32),
    }


def _pick_batch_tile(B, batch_tile):
    tb = min(batch_tile, max(8, _round_up(B, 8)))
    # v7x has 2 TensorCores: if the batch fits in a single tile but is big enough to split,
    # halve the tile so the "parallel" grid has >= 2 entries (one per core).
    if B >= 16 and pl.cdiv(_round_up(B, 8), tb) < 2:
        tb = max(8, _round_up(pl.cdiv(B, 2), 8))
    return tb


def qnetwork_forward(x, prepared_params, *, batch_tile=4096):
    """x: (B, state_size) f32.  prepared_params: output of prepare_params()."""
    p = prepared_params
    w1, b1, w2, b2, w3, b3 = p["w1"], p["b1"], p["w2"], p["b2"], p["w3"], p["b3"]
    B, state_size = x.shape
    action_size = w3.shape[1]

    tb = _pick_batch_tile(B, batch_tile)
    Bp = _round_up(B, tb)
    if Bp != B:
        # Explicit zero row-padding keeps out-of-range rows deterministic; sliced off below.
        x = jnp.pad(x, ((0, Bp - B), (0, 0)))

    grid = (Bp // tb,)
    # Constant index_map -> fetched once, stays resident in VMEM across all batch tiles.
    resident = lambda a: pl.BlockSpec(a.shape, lambda i: (0, 0))

    out = pl.pallas_call(
        qnet_kernel,
        out_shape=jax.ShapeDtypeStruct((Bp, action_size), jnp.float32),
        grid=grid,
        in_specs=[
            # Streamed operand: unpadded feature dim (== full array dim, legal even < 128).
            pl.BlockSpec((tb, state_size), lambda i: (i, 0)),
            resident(w1), resident(b1),
            resident(w2), resident(b2),
            resident(w3), resident(b3),
        ],
        # Narrow writeback: action_size-wide block instead of a 128-lane slab.
        out_specs=pl.BlockSpec((tb, action_size), lambda i: (i, 0)),
        compiler_params=pltpu.CompilerParams(
            dimension_semantics=("parallel",),      # shard batch tiles across TCs (v7x)
            vmem_limit_bytes=32 * 1024 * 1024,
        ),
    )(x, w1, b1, w2, b2, w3, b3)

    return out[:B] if Bp != B else out


def init_params(key, state_size, action_size):
    """Deterministic init mimicking PyTorch nn.Linear default (uniform +/- 1/sqrt(fan_in))."""
    ks = jax.random.split(key, 6)

    def linear(kw, kb, fan_in, fan_out):
        bound = 1.0 / jnp.sqrt(float(fan_in))
        w = jax.random.uniform(kw, (fan_in, fan_out), jnp.float32, -bound, bound)
        b = jax.random.uniform(kb, (1, fan_out), jnp.float32, -bound, bound)
        return w, b

    w1, b1 = linear(ks[0], ks[1], state_size, 32)
    w2, b2 = linear(ks[2], ks[3], 32, 64)
    w3, b3 = linear(ks[4], ks[5], 64, action_size)
    return {"w1": w1, "b1": b1, "w2": w2, "b2": b2, "w3": w3, "b3": b3}


def reference_forward(x, p):
    h1 = jnp.maximum(x @ p["w1"] + p["b1"], 0.0)
    h2 = jnp.maximum(h1 @ p["w2"] + p["b2"], 0.0)
    return h2 @ p["w3"] + p["b3"]


if __name__ == "__main__":
    key = jax.random.PRNGKey(0)
    k_x, k_p, k_big, k_odd = jax.random.split(key, 4)

    batch = 8
    state_size = 8     # continuous state dimension
    action_size = 4    # number of actions

    x = jax.random.normal(k_x, (batch, state_size), jnp.float32)
    params = init_params(k_p, state_size, action_size)
    ref = reference_forward(x, params)

    # Exact path (f32 weights): must match the pure-JAX reference tightly.
    p_f32 = prepare_params(params, use_bf16=False)
    out_f32 = jax.block_until_ready(qnetwork_forward(x, p_f32))
    assert out_f32.shape == (batch, action_size)
    assert jnp.allclose(out_f32, ref, atol=1e-5, rtol=1e-5), "f32 path mismatch vs reference"

    # Fast path (bf16 MXU operands, f32 accumulation): loose tolerance per bf16 precision.
    p_bf16 = prepare_params(params, use_bf16=True)
    out_bf16 = jax.block_until_ready(qnetwork_forward(x, p_bf16))
    assert out_bf16.shape == (batch, action_size)
    assert jnp.allclose(out_bf16, ref, atol=5e-2, rtol=5e-2), "bf16 path mismatch vs reference"

    # Multi-tile batch: 1024 rows -> tile halved to 512 so the "parallel" grid has 2 tiles.
    xb = jax.random.normal(k_big, (1024, state_size), jnp.float32)
    out_big = jax.block_until_ready(qnetwork_forward(xb, p_bf16))
    assert out_big.shape == (1024, action_size)
    assert jnp.allclose(out_big, reference_forward(xb, params), atol=5e-2, rtol=5e-2), \
        "tiled batch mismatch"

    # Ragged batch (37 rows): exercises explicit zero row-padding + row slice.
    xo = jax.random.normal(k_odd, (37, state_size), jnp.float32)
    out_odd = jax.block_until_ready(qnetwork_forward(xo, p_bf16))
    assert out_odd.shape == (37, action_size)
    assert jnp.allclose(out_odd, reference_forward(xo, params), atol=5e-2, rtol=5e-2), \
        "ragged batch mismatch"

    print("KERNEL_OK")
</pallas_src>

<mosaic_0001>
module attributes {stable_mosaic.version = 11 : i64} {
  func.func @qnet_kernel(%arg0: i32, %arg1: memref<8x8xf32, #tpu.memory_space<vmem>>, %arg2: memref<8x32xf32, #tpu.memory_space<vmem>>, %arg3: memref<1x32xf32, #tpu.memory_space<vmem>>, %arg4: memref<32x64xf32, #tpu.memory_space<vmem>>, %arg5: memref<1x64xf32, #tpu.memory_space<vmem>>, %arg6: memref<64x4xf32, #tpu.memory_space<vmem>>, %arg7: memref<1x4xf32, #tpu.memory_space<vmem>>, %arg8: memref<8x4xf32, #tpu.memory_space<vmem>>) attributes {dimension_semantics = [#tpu.dimension_semantics<parallel>], iteration_bounds = array<i64: 1>, scalar_prefetch = 0 : i64, scratch_operands = 0 : i64, tpu.core_type = #tpu.core_type<tc>, window_params = [{transform_indices = @transform_0, window_bounds = array<i64: 8, 8>}, {pipeline_mode = #tpu.pipeline_mode<synchronous>, transform_indices = @transform_1, window_bounds = array<i64: 8, 32>}, {pipeline_mode = #tpu.pipeline_mode<synchronous>, transform_indices = @transform_2, window_bounds = array<i64: 1, 32>}, {pipeline_mode = #tpu.pipeline_mode<synchronous>, transform_indices = @transform_3, window_bounds = array<i64: 32, 64>}, {pipeline_mode = #tpu.pipeline_mode<synchronous>, transform_indices = @transform_4, window_bounds = array<i64: 1, 64>}, {pipeline_mode = #tpu.pipeline_mode<synchronous>, transform_indices = @transform_5, window_bounds = array<i64: 64, 4>}, {pipeline_mode = #tpu.pipeline_mode<synchronous>, transform_indices = @transform_6, window_bounds = array<i64: 1, 4>}, {transform_indices = @transform_7, window_bounds = array<i64: 8, 4>}]} {
    %c0 = arith.constant 0 : index
    %c0_0 = arith.constant 0 : index
    %0 = vector.load %arg1[%c0, %c0_0] : memref<8x8xf32, #tpu.memory_space<vmem>>, vector<8x8xf32>
    %c0_1 = arith.constant 0 : index
    %c0_2 = arith.constant 0 : index
    %1 = vector.load %arg2[%c0_1, %c0_2] : memref<8x32xf32, #tpu.memory_space<vmem>>, vector<8x32xf32>
    %cst = arith.constant dense<0.000000e+00> : vector<8x32xf32>
    %2 = tpu.matmul %0, %1, %cst {dimension_numbers = #tpu.dot_dimension_numbers<[1], [0], [0], [1], [0, 0, 1, 1], [], []>} : vector<8x8xf32>, vector<8x32xf32>, vector<8x32xf32> -> vector<8x32xf32>
    %c0_3 = arith.constant 0 : index
    %c0_4 = arith.constant 0 : index
    %3 = vector.load %arg3[%c0_3, %c0_4] : memref<1x32xf32, #tpu.memory_space<vmem>>, vector<1x32xf32>
    %4 = vector.broadcast %3 : vector<1x32xf32> to vector<8x32xf32>
    %5 = arith.addf %2, %4 : vector<8x32xf32>
    %cst_5 = arith.constant 0.000000e+00 : f32
    %6 = vector.broadcast %cst_5 : f32 to vector<8x32xf32>
    %7 = arith.maximumf %5, %6 : vector<8x32xf32>
    %c0_6 = arith.constant 0 : index
    %c0_7 = arith.constant 0 : index
    %8 = vector.load %arg4[%c0_6, %c0_7] : memref<32x64xf32, #tpu.memory_space<vmem>>, vector<32x64xf32>
    %cst_8 = arith.constant dense<0.000000e+00> : vector<8x64xf32>
    %9 = tpu.matmul %7, %8, %cst_8 {dimension_numbers = #tpu.dot_dimension_numbers<[1], [0], [0], [1], [0, 0, 1, 1], [], []>} : vector<8x32xf32>, vector<32x64xf32>, vector<8x64xf32> -> vector<8x64xf32>
    %c0_9 = arith.constant 0 : index
    %c0_10 = arith.constant 0 : index
    %10 = vector.load %arg5[%c0_9, %c0_10] : memref<1x64xf32, #tpu.memory_space<vmem>>, vector<1x64xf32>
    %11 = vector.broadcast %10 : vector<1x64xf32> to vector<8x64xf32>
    %12 = arith.addf %9, %11 : vector<8x64xf32>
    %cst_11 = arith.constant 0.000000e+00 : f32
    %13 = vector.broadcast %cst_11 : f32 to vector<8x64xf32>
    %14 = arith.maximumf %12, %13 : vector<8x64xf32>
    %c0_12 = arith.constant 0 : index
    %c0_13 = arith.constant 0 : index
    %15 = vector.load %arg6[%c0_12, %c0_13] : memref<64x4xf32, #tpu.memory_space<vmem>>, vector<64x4xf32>
    %cst_14 = arith.constant dense<0.000000e+00> : vector<8x4xf32>
    %16 = tpu.matmul %14, %15, %cst_14 {dimension_numbers = #tpu.dot_dimension_numbers<[1], [0], [0], [1], [0, 0, 1, 1], [], []>} : vector<8x64xf32>, vector<64x4xf32>, vector<8x4xf32> -> vector<8x4xf32>
    %c0_15 = arith.constant 0 : index
    %c0_16 = arith.constant 0 : index
    %17 = vector.load %arg7[%c0_15, %c0_16] : memref<1x4xf32, #tpu.memory_space<vmem>>, vector<1x4xf32>
    %18 = vector.broadcast %17 : vector<1x4xf32> to vector<8x4xf32>
    %19 = arith.addf %16, %18 : vector<8x4xf32>
    %c0_17 = arith.constant 0 : index
    %c0_18 = arith.constant 0 : index
    %20 = vector.load %arg8[%c0_17, %c0_18] : memref<8x4xf32, #tpu.memory_space<vmem>>, vector<8x4xf32>
    tpu.vector_store %arg8[%c0_17, %c0_18], %19 {strides = array<i32>} : memref<8x4xf32, #tpu.memory_space<vmem>>, vector<8x4xf32>,
    return
  }
  func.func @transform_0(%arg0: i32) -> (i32, i32) {
    %c0_i32 = arith.constant 0 : i32
    %c0_i32_0 = arith.constant 0 : i32
    return %arg0, %c0_i32 : i32, i32
  }
  func.func @transform_1(%arg0: i32) -> (i32, i32) {
    %c0_i32 = arith.constant 0 : i32
    %c0_i32_0 = arith.constant 0 : i32
    %c0_i32_1 = arith.constant 0 : i32
    return %c0_i32, %c0_i32_0 : i32, i32
  }
  func.func @transform_2(%arg0: i32) -> (i32, i32) {
    %c0_i32 = arith.constant 0 : i32
    %c0_i32_0 = arith.constant 0 : i32
    %c0_i32_1 = arith.constant 0 : i32
    return %c0_i32, %c0_i32_0 : i32, i32
  }
  func.func @transform_3(%arg0: i32) -> (i32, i32) {
    %c0_i32 = arith.constant 0 : i32
    %c0_i32_0 = arith.constant 0 : i32
    %c0_i32_1 = arith.constant 0 : i32
    return %c0_i32, %c0_i32_0 : i32, i32
  }
  func.func @transform_4(%arg0: i32) -> (i32, i32) {
    %c0_i32 = arith.constant 0 : i32
    %c0_i32_0 = arith.constant 0 : i32
    %c0_i32_1 = arith.constant 0 : i32
    return %c0_i32, %c0_i32_0 : i32, i32
  }
  func.func @transform_5(%arg0: i32) -> (i32, i32) {
    %c0_i32 = arith.constant 0 : i32
    %c0_i32_0 = arith.constant 0 : i32
    %c0_i32_1 = arith.constant 0 : i32
    return %c0_i32, %c0_i32_0 : i32, i32
  }
  func.func @transform_6(%arg0: i32) -> (i32, i32) {
    %c0_i32 = arith.constant 0 : i32
    %c0_i32_0 = arith.constant 0 : i32
    %c0_i32_1 = arith.constant 0 : i32
    return %c0_i32, %c0_i32_0 : i32, i32
  }
  func.func @transform_7(%arg0: i32) -> (i32, i32) {
    %c0_i32 = arith.constant 0 : i32
    %c0_i32_0 = arith.constant 0 : i32
    return %arg0, %c0_i32 : i32, i32
  }
}

</mosaic_0001>

<bundles_post_ra>
// kernel: tpu_custom_call.1
= control target key start
LH: loop header
LB: loop body
LE: loop exit
PB: predicated region body
PF: predicated region fallthrough
CT: control target
= control target key end

     0   :  { %vm35_vm0 = vcmask 64512   ;;  %v369_v0 = vmov 0.0   ;;  %vm370_vm1 = vmmov 0   ;;  %v371_v5 = vmov 0.0|0.0   ;;  %s466_s1 = inlined_call_operand.vmem [shape: f32[8,32], index: 1, kind: input, shape index: {}]   ;;  %s467_s0 = inlined_call_operand.vmem [shape: f32[8,8], index: 0, kind: input, shape index: {}]   ;;  %s468_s3 = inlined_call_operand.vmem [shape: f32[32,64], index: 3, kind: input, shape index: {}]   ;;  %s469_s5 = inlined_call_operand.vmem [shape: f32[64,4], index: 5, kind: input, shape index: {}]   ;;  %s470_s2 = inlined_call_operand.vmem [shape: f32[1,32], index: 2, kind: input, shape index: {}]   ;;  %s471_s4 = inlined_call_operand.vmem [shape: f32[1,64], index: 4, kind: input, shape index: {}]   ;;  %s472_s6 = inlined_call_operand.vmem [shape: f32[1,4], index: 6, kind: input, shape index: {}]   ;;  %s473_s7 = inlined_call_operand.vmem [shape: f32[8,4], index: 7, kind: output, shape index: {}]  }
   0x1   :  { %313 = vmatprep.subr.mxu1 %v369_v0  ;;  %v27_v1 = vld [vmem:[%s466_s1] sm:$0xff]  ;;  %315 = vmatprep.mubr.msk.f32.mxu1 %vm370_vm1, %v369_v0  ;;  %v111_v4 = vld [vmem:[%s468_s3 + $0x8] sm:$0xff]  ;;  %v112_v7 = vld [vmem:[%s468_s3 + $0x10] sm:$0xff]  ;;  %vm121_vm2 = vcmask 261120   ;;  %vm211_vm3 = vcmask 523264   ;;  %vm285_vm4 = vcmask 31744  }
   0x2   :  { %v26_v2 = vld [vmem:[%s467_s0] sm:$0xff]  ;;  %314 = vmatpush3.msra.mxu1 %v27_v1  ;;  %354 = vmatprep.subr.bf16.mxu0 %v371_v5  ;;  %v113_v8 = vld [vmem:[%s468_s3 + $0x18] sm:$0xff]  ;;  %v197_v11 = vld [vmem:[%s469_s5 + $0x8] sm:$0xff] }
   0x3   :  { %v110_v3 = vld [vmem:[%s468_s3] sm:$0xff]  ;;  %316 = vmatmul.mubr.msk.f32.vlgmr.msra.gmra.mrb[0].mxu1 %vm35_vm0, %v26_v2  ;;  %348 = vmatprep.subr.bf16.mxu1 %v371_v5  ;;  %v352_v9 = vpack.c.bf16 %v113_v8, %v112_v7  ;;  %v198_v12 = vld [vmem:[%s469_s5 + $0x10] sm:$0xff]  ;;  %v199_v14 = vld [vmem:[%s469_s5 + $0x18] sm:$0xff] }
   0x4   :  { %v349_v6 = vpack.c.bf16 %v111_v4, %v110_v3  ;;  %326 = vmatprep.mubr.msk.f32.mxu1 %vm370_vm1, %v369_v0  ;;  %345 = vmatprep.mubr.msk.f32.mxu0 %vm370_vm1, %v369_v0  ;;  %v196_v10 = vld [vmem:[%s469_s5] sm:$0xff]  ;;  %v358_v15 = vpack.c.bf16 %v199_v14, %v198_v12  ;;  %v201_v17 = vld [vmem:[%s469_s5 + $0x28] sm:$0xff]  ;;  %v202_v24 = vld [vmem:[%s469_s5 + $0x30] sm:$0xff] }
   0x5   :  { %v355_v13 = vpack.c.bf16 %v197_v11, %v196_v10  ;;  %v200_v16 = vld [vmem:[%s469_s5 + $0x20] sm:$0xff]  ;;  %v203_v25 = vld [vmem:[%s469_s5 + $0x38] sm:$0xff] }
   0x6   :  { %350 = vmatpush3.bf16.msra.mxu1 %v349_v6  ;;  %v361_v18 = vpack.c.bf16 %v201_v17, %v200_v16  ;;  %v291_v19 = vld [vmem:[%s470_s2] ss:$0 sm:$0xff]  ;;  %v364_v26 = vpack.c.bf16 %v203_v25, %v202_v24 }
   0x7   :  { %351 = vmatprep.subr.bf16.mxu1 %v371_v5  ;;  %356 = vmatpush3.bf16.msra.mxu0 %v355_v13  ;;  %v293_v27 = vld [vmem:[%s471_s4] ss:$0 sm:$0xff] }
   0x8   :  { %357 = vmatprep.subr.bf16.mxu0 %v371_v5  ;;  %v295_v32 = vld [vmem:[%s472_s6] ss:$0 sm:$0xff] }
   0xa   :  { %353 = vmatpush3.bf16.msra.mxu1 %v352_v9 }
   0xb   :  { %359 = vmatpush3.bf16.msra.mxu0 %v358_v15 }
   0xc   :  { %360 = vmatprep.subr.bf16.mxu0 %v371_v5 }
   0xf   :  { %362 = vmatpush3.bf16.msra.mxu0 %v361_v18 }
  0x10   :  { %363 = vmatprep.subr.bf16.mxu0 %v371_v5 }
  0x13   :  { %365 = vmatpush3.bf16.msra.mxu0 %v364_v26 }
  0xd6   :  { %v105_v20 = vpop.f32.mrb[0].mxu1 }
  0xd7   :  { %v106_v21 = vadd.f32 %v291_v19, %v105_v20  ;;  %v317_v22 = vpop.f32.mrb[1].mxu1 }
  0xd9   :  { %v109_v23 = vmax.f32 %v106_v21, 0.0 }
  0xdb   :  { %327 = vmatmul.mubr.msk.f32.vlgmr.msra.gmra.mrb[2].mxu1 %vm121_vm2, %v109_v23 }
 0x1ae   :  { %v191_v28 = vpop.f32.mrb[2].mxu1 }
 0x1af   :  { %v192_v29 = vadd.f32 %v293_v27, %v191_v28  ;;  %v328_v30 = vpop.f32.mrb[3].mxu1 }
 0x1b1   :  { %v195_v31 = vmax.f32 %v192_v29, 0.0 }
 0x1b3   :  { %346 = vmatmul.mubr.msk.f32.vlgmr.msra.gmra.mrb[0].mxu0 %vm211_vm3, %v195_v31 }
 0x286   :  { %v281_v33 = vpop.f32.mrb[0].mxu0 }
 0x287   :  { %v282_v34 = vadd.f32 %v295_v32, %v281_v33  ;;  %v347_v35 = vpop.f32.mrb[1].mxu0 }
 0x289   :  { %286 = vst.msk [vmem:[%s473_s7] sm:$0xff] %vm285_vm4, %v282_v34 }

</bundles_post_ra>
